<compile_context>
chip_gen: v7x
topology: tpu7x:2x2x1
jax: 0.10.0
libtpu: 0.0.40
codegen_flags: <defaults>
</compile_context>

<pallas_src>
import functools

import jax
import jax.numpy as jnp
from jax import lax
from jax.experimental import pallas as pl
from jax.experimental.pallas import tpu as pltpu

BN_EPS = 1e-5


def _convblock_kernel(lhs_ref, w_ref, red_ref, bcast_ref, g_ref, b_ref, o_ref,
                      *, inv_count):
    """Single program; the whole (tiny) problem resides in VMEM.

    lhs_ref:   (N*H, 3*(W+2)*Cin)   row-packed padded input        (bf16)
    w_ref:     (3*(W+2)*Cin, W*Cout) block-Toeplitz conv weight    (bf16)
    red_ref:   (W*Cout, Cout)       one-hot reduce:   R[(w,c), c'] = [c==c']
    bcast_ref: (Cout, W*Cout)       one-hot broadcast: R.T
    g_ref:     (1, Cout)            BN gamma
    b_ref:     (1, Cout)            BN beta
    o_ref:     (N*H, W*Cout)        lane-dense output slab          (f32)
    """
    # 3x3 'same' conv == one MXU matmul producing the lane-dense output layout.
    y = jnp.dot(lhs_ref[...], w_ref[...], preferred_element_type=jnp.float32)

    # Training-mode BatchNorm2d, one-pass moments.  Reduce over rows first
    # (XLU sublane reduce), then over the packed w positions via the tiny
    # (1,L)@(L,Cout) one-hot matmul -- ~32x less stats MXU work than y@M.
    row_sum = jnp.sum(y, axis=0, keepdims=True)          # (1, L)
    row_sq = jnp.sum(y * y, axis=0, keepdims=True)       # (1, L)
    mean = jnp.dot(row_sum, red_ref[...],
                   preferred_element_type=jnp.float32) * inv_count   # (1, Cout)
    ex2 = jnp.dot(row_sq, red_ref[...],
                  preferred_element_type=jnp.float32) * inv_count
    var = jnp.maximum(ex2 - mean * mean, 0.0)            # clamp: no NaN from rsqrt

    # Per-channel affine, then broadcast back into the packed (w, c) lane layout
    # with the (Cout, L) one-hot matmul.  rsqrt runs on the EUP slot.
    scale_c = g_ref[...] * lax.rsqrt(var + BN_EPS)       # (1, Cout)
    shift_c = b_ref[...] - mean * scale_c
    scale = jnp.dot(scale_c, bcast_ref[...], preferred_element_type=jnp.float32)
    shift = jnp.dot(shift_c, bcast_ref[...], preferred_element_type=jnp.float32)

    o_ref[...] = jnp.maximum(y * scale + shift, 0.0)


@jax.jit
def conv_block_forward(x_nchw, w_hwio, bias, gamma, beta):
    """x_nchw: (N, Cin, H, W) f32 -> (N, Cout, H, W) f32.

    `bias` is accepted for interface parity with nn.Conv2d but intentionally
    unused: under training-mode BatchNorm a per-channel constant added before
    the batch-mean subtraction has zero effect on the output.
    """
    del bias
    N, Cin, H, W = x_nchw.shape
    Cout = w_hwio.shape[-1]
    Wp = W + 2
    K = 3 * Wp * Cin          # contraction dim of the row-im2col matmul
    L = W * Cout              # lane-dense output width (128 at toy shapes)
    NH = N * H

    # ---- layout glue (plain JAX, fused by XLA around the pallas_call) -------
    x_nhwc = jnp.transpose(x_nchw, (0, 2, 3, 1))
    x_pad = jnp.pad(x_nhwc, ((0, 0), (1, 1), (1, 1), (0, 0)))
    # lhs[(n,h), (dy, xc, ci)] = x_pad[n, h+dy, xc, ci]
    lhs = jnp.stack([x_pad[:, dy:dy + H] for dy in range(3)], axis=2)
    lhs = lhs.reshape(NH, K).astype(jnp.bfloat16)

    # Block-Toeplitz weight via a single einsum against a compile-time 0/1
    # shift mask (replaces 16 serialized dynamic-update-slices):
    #   wtoe[(dy,xc,ci), (w,co)] = w_hwio[dy, xc-w, ci, co] for 0 <= xc-w < 3.
    shift_mask = (jnp.arange(Wp)[:, None, None]
                  == jnp.arange(3)[None, :, None] + jnp.arange(W)[None, None, :]
                  ).astype(jnp.float32)                              # (Wp, 3, W)
    wtoe = jnp.einsum('dkio,xkw->dxiwo', w_hwio, shift_mask).reshape(K, L)
    wtoe = wtoe.astype(jnp.bfloat16)

    # Factored channel selector: (L, Cout) reduce one-hot and its transpose.
    cc = jnp.arange(L) % Cout
    red = (cc[:, None] == jnp.arange(Cout)[None, :]).astype(jnp.float32)
    bcast = red.T

    gamma_c = gamma.reshape(1, Cout).astype(jnp.float32)
    beta_c = beta.reshape(1, Cout).astype(jnp.float32)

    kernel = functools.partial(_convblock_kernel,
                               inv_count=1.0 / float(N * H * W))
    vmem = pl.BlockSpec(memory_space=pltpu.MemorySpace.VMEM)
    cost = pl.CostEstimate(
        flops=2 * NH * K * L + 2 * 2 * L * Cout + 2 * 2 * Cout * L + 8 * NH * L,
        transcendentals=Cout,
        bytes_accessed=(2 * (NH * K + K * L)                  # bf16 operands
                        + 4 * (2 * L * Cout + 2 * Cout + NH * L)),
    )

    y2d = pl.pallas_call(
        kernel,
        out_shape=jax.ShapeDtypeStruct((NH, L), jnp.float32),
        in_specs=[vmem, vmem, vmem, vmem, vmem, vmem],
        out_specs=vmem,
        cost_estimate=cost,
    )(lhs, wtoe, red, bcast, gamma_c, beta_c)

    # (N*H, W*Cout) -> (N, H, W, Cout) -> NCHW
    return jnp.transpose(y2d.reshape(N, H, W, Cout), (0, 3, 1, 2))


def _reference(x_nchw, w_hwio, bias, gamma, beta):
    """Pure-JAX f32 reference matching the PyTorch module (training-mode BN).

    Note: the reference DOES add the conv bias; the kernel omits it because
    training-mode BN cancels it exactly.
    """
    x_nhwc = jnp.transpose(x_nchw, (0, 2, 3, 1))
    y = lax.conv_general_dilated(
        x_nhwc, w_hwio, window_strides=(1, 1), padding="SAME",
        dimension_numbers=("NHWC", "HWIO", "NHWC"))
    y = y + bias.reshape(1, 1, 1, -1)
    mean = jnp.mean(y, axis=(0, 1, 2), keepdims=True)
    var = jnp.mean((y - mean) ** 2, axis=(0, 1, 2), keepdims=True)
    y = (y - mean) * lax.rsqrt(var + BN_EPS)
    y = y * gamma.reshape(1, 1, 1, -1) + beta.reshape(1, 1, 1, -1)
    y = jnp.maximum(y, 0.0)
    return jnp.transpose(y, (0, 3, 1, 2))


if __name__ == "__main__":
    # Small shapes consistent with the module: batch=2, input_channels=4,
    # num_filters=8, spatial=16x16.
    N, Cin, Cout, H, W = 2, 4, 8, 16, 16

    key = jax.random.PRNGKey(0)
    kx, kw, kb = jax.random.split(key, 3)

    x = jax.random.normal(kx, (N, Cin, H, W), dtype=jnp.float32)

    # Deterministic parameter init (shapes from nn.Conv2d / nn.BatchNorm2d):
    #   conv weight (Cout, Cin, 3, 3) -> stored HWIO (3, 3, Cin, Cout)
    fan_in = Cin * 3 * 3
    w_oihw = jax.random.uniform(kw, (Cout, Cin, 3, 3), jnp.float32,
                                minval=-1.0, maxval=1.0) / jnp.sqrt(fan_in)
    w_hwio = jnp.transpose(w_oihw, (2, 3, 1, 0))
    bias = jax.random.uniform(kb, (Cout,), jnp.float32,
                              minval=-1.0, maxval=1.0) / jnp.sqrt(fan_in)
    gamma = jnp.ones((Cout,), jnp.float32)   # BatchNorm2d init: weight = 1
    beta = jnp.zeros((Cout,), jnp.float32)   # BatchNorm2d init: bias = 0

    out = conv_block_forward(x, w_hwio, bias, gamma, beta)
    jax.block_until_ready(out)

    ref = _reference(x, w_hwio, bias, gamma, beta)
    assert out.shape == (N, Cout, H, W)
    # Tolerance loosened vs. the pure-f32 version: the conv matmul operands are
    # bf16 (f32 accumulation); observed error is ~1e-3 on unit-variance outputs.
    assert jnp.allclose(out, ref, atol=3e-2, rtol=3e-2), "mismatch vs reference"

    print("KERNEL_OK")
</pallas_src>

<mosaic_0001>
module attributes {stable_mosaic.version = 11 : i64} {
  func.func @_convblock_kernel(%arg0: memref<32x216xbf16, #tpu.memory_space<vmem>>, %arg1: memref<216x128xbf16, #tpu.memory_space<vmem>>, %arg2: memref<128x8xf32, #tpu.memory_space<vmem>>, %arg3: memref<8x128xf32, #tpu.memory_space<vmem>>, %arg4: memref<1x8xf32, #tpu.memory_space<vmem>>, %arg5: memref<1x8xf32, #tpu.memory_space<vmem>>, %arg6: memref<32x128xf32, #tpu.memory_space<vmem>>) attributes {dimension_semantics = [], scalar_prefetch = 0 : i64, scratch_operands = 0 : i64, tpu.core_type = #tpu.core_type<tc>} {
    %c0 = arith.constant 0 : index
    %c0_0 = arith.constant 0 : index
    %0 = vector.load %arg0[%c0, %c0_0] : memref<32x216xbf16, #tpu.memory_space<vmem>>, vector<32x216xbf16>
    %c0_1 = arith.constant 0 : index
    %c0_2 = arith.constant 0 : index
    %1 = vector.load %arg1[%c0_1, %c0_2] : memref<216x128xbf16, #tpu.memory_space<vmem>>, vector<216x128xbf16>
    %cst = arith.constant dense<0.000000e+00> : vector<32x128xf32>
    %2 = tpu.matmul %0, %1, %cst {dimension_numbers = #tpu.dot_dimension_numbers<[1], [0], [0], [1], [0, 0, 1, 1], [], []>} : vector<32x216xbf16>, vector<216x128xbf16>, vector<32x128xf32> -> vector<32x128xf32>
    %cst_3 = arith.constant dense<0.000000e+00> : vector<128xf32>
    %3 = vector.multi_reduction <add>, %2, %cst_3 [0] : vector<32x128xf32> to vector<128xf32>
    %4 = vector.shape_cast %3 : vector<128xf32> to vector<1x128xf32>
    %5 = arith.mulf %2, %2 : vector<32x128xf32>
    %cst_4 = arith.constant dense<0.000000e+00> : vector<128xf32>
    %6 = vector.multi_reduction <add>, %5, %cst_4 [0] : vector<32x128xf32> to vector<128xf32>
    %7 = vector.shape_cast %6 : vector<128xf32> to vector<1x128xf32>
    %c0_5 = arith.constant 0 : index
    %c0_6 = arith.constant 0 : index
    %8 = vector.load %arg2[%c0_5, %c0_6] : memref<128x8xf32, #tpu.memory_space<vmem>>, vector<128x8xf32>
    %cst_7 = arith.constant dense<0.000000e+00> : vector<1x8xf32>
    %9 = tpu.matmul %4, %8, %cst_7 {dimension_numbers = #tpu.dot_dimension_numbers<[1], [0], [0], [1], [0, 0, 1, 1], [], []>} : vector<1x128xf32>, vector<128x8xf32>, vector<1x8xf32> -> vector<1x8xf32>
    %cst_8 = arith.constant 0.001953125 : f32
    %10 = vector.broadcast %cst_8 : f32 to vector<1x8xf32>
    %11 = arith.mulf %9, %10 : vector<1x8xf32>
    %c0_9 = arith.constant 0 : index
    %c0_10 = arith.constant 0 : index
    %12 = vector.load %arg2[%c0_9, %c0_10] : memref<128x8xf32, #tpu.memory_space<vmem>>, vector<128x8xf32>
    %cst_11 = arith.constant dense<0.000000e+00> : vector<1x8xf32>
    %13 = tpu.matmul %7, %12, %cst_11 {dimension_numbers = #tpu.dot_dimension_numbers<[1], [0], [0], [1], [0, 0, 1, 1], [], []>} : vector<1x128xf32>, vector<128x8xf32>, vector<1x8xf32> -> vector<1x8xf32>
    %cst_12 = arith.constant 0.001953125 : f32
    %14 = vector.broadcast %cst_12 : f32 to vector<1x8xf32>
    %15 = arith.mulf %13, %14 : vector<1x8xf32>
    %16 = arith.mulf %11, %11 : vector<1x8xf32>
    %17 = arith.subf %15, %16 : vector<1x8xf32>
    %cst_13 = arith.constant 0.000000e+00 : f32
    %18 = vector.broadcast %cst_13 : f32 to vector<1x8xf32>
    %19 = arith.maximumf %17, %18 : vector<1x8xf32>
    %c0_14 = arith.constant 0 : index
    %c0_15 = arith.constant 0 : index
    %20 = vector.load %arg4[%c0_14, %c0_15] : memref<1x8xf32, #tpu.memory_space<vmem>>, vector<1x8xf32>
    %cst_16 = arith.constant 9.99999974E-6 : f32
    %21 = vector.broadcast %cst_16 : f32 to vector<1x8xf32>
    %22 = arith.addf %19, %21 : vector<1x8xf32>
    %23 = math.rsqrt %22 : vector<1x8xf32>
    %24 = arith.mulf %20, %23 : vector<1x8xf32>
    %c0_17 = arith.constant 0 : index
    %c0_18 = arith.constant 0 : index
    %25 = vector.load %arg5[%c0_17, %c0_18] : memref<1x8xf32, #tpu.memory_space<vmem>>, vector<1x8xf32>
    %26 = arith.mulf %11, %24 : vector<1x8xf32>
    %27 = arith.subf %25, %26 : vector<1x8xf32>
    %c0_19 = arith.constant 0 : index
    %c0_20 = arith.constant 0 : index
    %28 = vector.load %arg3[%c0_19, %c0_20] : memref<8x128xf32, #tpu.memory_space<vmem>>, vector<8x128xf32>
    %cst_21 = arith.constant dense<0.000000e+00> : vector<1x128xf32>
    %29 = tpu.matmul %24, %28, %cst_21 {dimension_numbers = #tpu.dot_dimension_numbers<[1], [0], [0], [1], [0, 0, 1, 1], [], []>} : vector<1x8xf32>, vector<8x128xf32>, vector<1x128xf32> -> vector<1x128xf32>
    %c0_22 = arith.constant 0 : index
    %c0_23 = arith.constant 0 : index
    %30 = vector.load %arg3[%c0_22, %c0_23] : memref<8x128xf32, #tpu.memory_space<vmem>>, vector<8x128xf32>
    %cst_24 = arith.constant dense<0.000000e+00> : vector<1x128xf32>
    %31 = tpu.matmul %27, %30, %cst_24 {dimension_numbers = #tpu.dot_dimension_numbers<[1], [0], [0], [1], [0, 0, 1, 1], [], []>} : vector<1x8xf32>, vector<8x128xf32>, vector<1x128xf32> -> vector<1x128xf32>
    %32 = vector.broadcast %29 : vector<1x128xf32> to vector<32x128xf32>
    %33 = arith.mulf %2, %32 : vector<32x128xf32>
    %34 = vector.broadcast %31 : vector<1x128xf32> to vector<32x128xf32>
    %35 = arith.addf %33, %34 : vector<32x128xf32>
    %cst_25 = arith.constant 0.000000e+00 : f32
    %36 = vector.broadcast %cst_25 : f32 to vector<32x128xf32>
    %37 = arith.maximumf %35, %36 : vector<32x128xf32>
    %c0_26 = arith.constant 0 : index
    %c0_27 = arith.constant 0 : index
    %38 = vector.load %arg6[%c0_26, %c0_27] : memref<32x128xf32, #tpu.memory_space<vmem>>, vector<32x128xf32>
    tpu.vector_store %arg6[%c0_26, %c0_27], %37 {strides = array<i32>} : memref<32x128xf32, #tpu.memory_space<vmem>>, vector<32x128xf32>,
    return
  }
}

</mosaic_0001>

<bundles_post_ra>
// kernel: conv_block_forward.1
= control target key start
LH: loop header
LB: loop body
LE: loop exit
PB: predicated region body
PF: predicated region fallthrough
CT: control target
= control target key end

     0   :  { %v794_v0 = vmov 0   ;;  %v795_v2 = vmov 0.0|0.0   ;;  %vm154_vm0 = vcmask 719872   ;;  %vm161_vm1 = vcmask 1043456   ;;  %s1010_s1 = inlined_call_operand.vmem [shape: bf16[216,128], index: 1, kind: input, shape index: {}]   ;;  %s1011_s0 = inlined_call_operand.vmem [shape: bf16[32,216], index: 0, kind: input, shape index: {}]   ;;  %s1012_s2 = inlined_call_operand.vmem [shape: f32[128,8], index: 2, kind: input, shape index: {}]   ;;  %s1013_s3 = inlined_call_operand.vmem [shape: f32[8,128], index: 3, kind: input, shape index: {}]   ;;  %s1014_s4 = inlined_call_operand.vmem [shape: f32[1,8], index: 4, kind: input, shape index: {}]   ;;  %s1015_s5 = inlined_call_operand.vmem [shape: f32[1,8], index: 5, kind: input, shape index: {}]   ;;  %s1016_s6 = inlined_call_operand.vmem [shape: f32[32,128], index: 6, kind: output, shape index: {}]  }
   0x1   :  { %165 = vmatprep.subr.bf16.mxu0 %v794_v0  ;;  %v772_v1 = vld [vmem:[%s1010_s1] sm:$0xff]   ;;  %720 = vmatprep.subr.bf16.mxu1 %v795_v2  ;;  %v773_v3 = vld [vmem:[%s1010_s1 + $0x8] sm:$0xff]   ;;  %v774_v4 = vld [vmem:[%s1010_s1 + $0x10] sm:$0xff]   ;;  %vm796_vm2 = vmmov 0   ;;  %v797_v45 = vmov 0.0   ;;  %vm405_vm3 = vcmask 64512  }
   0x2   :  { %166 = vmatpush1.bf16.msra.mxu0 %v772_v1  ;;  %v775_v5 = vld [vmem:[%s1010_s1 + $0x18] sm:$0xff]   ;;  %v776_v6 = vld [vmem:[%s1010_s1 + $0x20] sm:$0xff]   ;;  %v237_v9 = vld [vmem:[%s1012_s2 + $0x8] sm:$0xff]  ;;  %672 = vmatprep.mubr.msk.f32.mxu1 %vm796_vm2, %v797_v45 }
   0x3   :  { %167 = vmatprep.subr.bf16.mxu0 %v794_v0  ;;  %v788_v7 = vld [vmem:[%s1011_s0 + $0x4] ss:$8 sps:$4 sm:$0xff]   ;;  %v238_v11 = vld [vmem:[%s1012_s2 + $0x10] sm:$0xff]  ;;  %v239_v12 = vld [vmem:[%s1012_s2 + $0x18] sm:$0xff] }
   0x4   :  { %598 = vmatprep.mubr.msk.bf16.mxu0 %vm154_vm0, %v788_v7  ;;  %v236_v8 = vld [vmem:[%s1012_s2] sm:$0xff]  ;;  %v777_v13 = vld [vmem:[%s1010_s1 + $0x28] sm:$0xff]   ;;  %v871_v14 = vpack.c.bf16 %v239_v12, %v238_v11  ;;  %v778_v15 = vld [vmem:[%s1010_s1 + $0x30] sm:$0xff]  }
   0x5   :  { %v859_v10 = vpack.c.bf16 %v237_v9, %v236_v8  ;;  %v779_v16 = vld [vmem:[%s1010_s1 + $0x38] sm:$0xff]   ;;  %v780_v17 = vld [vmem:[%s1010_s1 + $0x40] sm:$0xff]   ;;  %v781_v18 = vld [vmem:[%s1010_s1 + $0x48] sm:$0xff]  }
   0x6   :  { %168 = vmatpush1.bf16.msra.mxu0 %v773_v3  ;;  %v782_v19 = vld [vmem:[%s1010_s1 + $0x50] sm:$0xff]   ;;  %v783_v20 = vld [vmem:[%s1010_s1 + $0x58] sm:$0xff]   ;;  %v784_v21 = vld [vmem:[%s1010_s1 + $0x60] sm:$0xff]  }
   0x7   :  { %169 = vmatprep.subr.bf16.mxu0 %v794_v0  ;;  %722 = vmatpush3.bf16.msra.mxu1 %v859_v10  ;;  %v785_v22 = vld [vmem:[%s1010_s1 + $0x68] ss:$0 sps:$4 sm:$0xff]   ;;  %v789_v25 = vld [vmem:[%s1011_s0 + $0x14] ss:$8 sps:$4 sm:$0xff]   ;;  %v791_v26 = vld [vmem:[%s1011_s0 + $0x10] ss:$8 sps:$4 sm:$0xff]  }
   0x8   :  { %723 = vmatprep.subr.bf16.mxu1 %v795_v2  ;;  %v163_v23 = vsel %vm161_vm1, %v785_v22, 0  ;;  %v786_v24 = vld [vmem:[%s1011_s0] ss:$8 sps:$4 sm:$0xff]   ;;  %v242_v30 = vld [vmem:[%s1012_s2 + $0x30] sm:$0xff]  ;;  %v243_v31 = vld [vmem:[%s1012_s2 + $0x38] sm:$0xff] }
   0x9   :  { %v240_v27 = vld [vmem:[%s1012_s2 + $0x20] sm:$0xff]  ;;  %v241_v28 = vld [vmem:[%s1012_s2 + $0x28] sm:$0xff]  ;;  %v730_v32 = vpack.c.bf16 %v243_v31, %v242_v30  ;;  %v246_v36 = vld [vmem:[%s1012_s2 + $0x50] sm:$0xff] }
   0xa   :  { %170 = vmatpush1.bf16.msra.mxu0 %v774_v4  ;;  %v727_v29 = vpack.c.bf16 %v241_v28, %v240_v27  ;;  %v244_v33 = vld [vmem:[%s1012_s2 + $0x40] sm:$0xff]  ;;  %v245_v34 = vld [vmem:[%s1012_s2 + $0x48] sm:$0xff]  ;;  %v247_v37 = vld [vmem:[%s1012_s2 + $0x58] sm:$0xff] }
   0xb   :  { %171 = vmatprep.subr.bf16.mxu0 %v794_v0  ;;  %725 = vmatpush3.bf16.msra.mxu1 %v871_v14  ;;  %v733_v35 = vpack.c.bf16 %v245_v34, %v244_v33  ;;  %v736_v38 = vpack.c.bf16 %v247_v37, %v246_v36  ;;  %v248_v39 = vld [vmem:[%s1012_s2 + $0x60] sm:$0xff]  ;;  %v249_v40 = vld [vmem:[%s1012_s2 + $0x68] sm:$0xff]  ;;  %v250_v42 = vld [vmem:[%s1012_s2 + $0x70] sm:$0xff] }
   0xc   :  { %726 = vmatprep.subr.bf16.mxu1 %v795_v2  ;;  %v739_v41 = vpack.c.bf16 %v249_v40, %v248_v39  ;;  %v251_v43 = vld [vmem:[%s1012_s2 + $0x78] sm:$0xff] }
   0xd   :  { %v742_v44 = vpack.c.bf16 %v251_v43, %v250_v42 }
   0xe   :  { %172 = vmatpush1.bf16.msra.mxu0 %v775_v5 }
   0xf   :  { %173 = vmatprep.subr.bf16.mxu0 %v794_v0  ;;  %728 = vmatpush3.bf16.msra.mxu1 %v727_v29 }
  0x10   :  { %729 = vmatprep.subr.bf16.mxu1 %v795_v2 }
  0x12   :  { %174 = vmatpush1.bf16.msra.mxu0 %v776_v6 }
  0x13   :  { %175 = vmatprep.subr.bf16.mxu0 %v794_v0  ;;  %731 = vmatpush3.bf16.msra.mxu1 %v730_v32 }
  0x14   :  { %732 = vmatprep.subr.bf16.mxu1 %v795_v2 }
  0x16   :  { %176 = vmatpush1.bf16.msra.mxu0 %v777_v13  ;;  %v404_v13 = vld [vmem:[%s1013_s3] sm:$0xff] }
  0x17   :  { %177 = vmatprep.subr.bf16.mxu0 %v794_v0  ;;  %734 = vmatpush3.bf16.msra.mxu1 %v733_v35 }
  0x18   :  { %735 = vmatprep.subr.bf16.mxu1 %v795_v2 }
  0x1a   :  { %178 = vmatpush1.bf16.msra.mxu0 %v778_v15 }
  0x1b   :  { %179 = vmatprep.subr.bf16.mxu0 %v794_v0  ;;  %737 = vmatpush3.bf16.msra.mxu1 %v736_v38 }
  0x1c   :  { %738 = vmatprep.subr.bf16.mxu1 %v795_v2 }
  0x1e   :  { %180 = vmatpush1.bf16.msra.mxu0 %v779_v16 }
  0x1f   :  { %181 = vmatprep.subr.bf16.mxu0 %v794_v0  ;;  %740 = vmatpush3.bf16.msra.mxu1 %v739_v41 }
  0x20   :  { %741 = vmatprep.subr.bf16.mxu1 %v795_v2 }
  0x22   :  { %182 = vmatpush1.bf16.msra.mxu0 %v780_v17 }
  0x23   :  { %183 = vmatprep.subr.bf16.mxu0 %v794_v0  ;;  %743 = vmatpush3.bf16.msra.mxu1 %v742_v44 }
  0x24   :  { %744 = vmatprep.subr.bf16.mxu1 %v795_v2 }
  0x26   :  { %184 = vmatpush1.bf16.msra.mxu0 %v781_v18 }
  0x27   :  { %185 = vmatprep.subr.bf16.mxu0 %v794_v0 }
  0x2a   :  { %186 = vmatpush1.bf16.msra.mxu0 %v782_v19 }
  0x2b   :  { %187 = vmatprep.subr.bf16.mxu0 %v794_v0 }
  0x2e   :  { %188 = vmatpush1.bf16.msra.mxu0 %v783_v20 }
  0x2f   :  { %189 = vmatprep.subr.bf16.mxu0 %v794_v0 }
  0x32   :  { %190 = vmatpush1.bf16.msra.mxu0 %v784_v21 }
  0x33   :  { %191 = vmatprep.subr.bf16.mxu0 %v794_v0 }
  0x36   :  { %192 = vmatpush1.bf16.msra.mxu0 %v163_v23  ;;  %v397_v23 = vld [vmem:[%s1014_s4] sm:$0x1] }
  0x37   :  { %715 = vmatprep.subr.mxu0 %v797_v45 }
  0x39   :  { %198 = vmatmul.mubr.bf16.vlgmr.msra.gmra.mrb[0].mxu0 %v786_v24 }
  0x3a   :  { %599 = vmatprep.mubr.msk.bf16.mxu0 %vm154_vm0, %v789_v25  ;;  %716 = vmatpush3.msra.mxu0 %v404_v13 }
  0x41   :  { %206 = vmatmul.mubr.bf16.gmra.mrb[4].mxu0 %v791_v26  ;;  %v401_v26 = vld [vmem:[%s1015_s5] sm:$0x1] }
  0x42   :  { %717 = vmatprep.mubr.msk.f32.mxu0 %vm796_vm2, %v797_v45 }
 0x10c   :  { %v954_v46 = vpop.f32.mrb[0].mxu0 }
 0x10d   :  { %v201_v47 = vpop.f32.mrb[1].mxu0  ;;  %v223_v49 = vmul.f32 %v954_v46, %v954_v46 }
 0x10e   :  { %v956_v48 = vpop.f32.mrb[2].mxu0 }
 0x10f   :  { %v214_v50 = vadd.f32 %v956_v48, %v954_v46  ;;  %v224_v51 = vmul.f32 %v956_v48, %v956_v48  ;;  %v204_v52 = vpop.f32.mrb[3].mxu0 }
 0x111   :  { %v227_v53 = vadd.f32 %v224_v51, %v223_v49 }
 0x114   :  { %v964_v54 = vpop.f32.mrb[4].mxu0 }
 0x115   :  { %v215_v55 = vadd.f32 %v214_v50, %v964_v54  ;;  %v225_v56 = vmul.f32 %v964_v54, %v964_v54  ;;  %v209_v57 = vpop.f32.mrb[5].mxu0 }
 0x116   :  { %v969_v58 = vpop.f32.mrb[6].mxu0 }
 0x117   :  { %v228_v59 = vadd.f32 %v227_v53, %v225_v56  ;;  %v216_v60 = vadd.f32 %v215_v55, %v969_v58  ;;  %v226_v61 = vmul.f32 %v969_v58, %v969_v58  ;;  %v212_v62 = vpop.f32.mrb[7].mxu0 }
 0x119   :  { %v217_v63 = vrot.slane %v216_v60, 4  ;;  %v229_v0 = vadd.f32 %v228_v59, %v226_v61 }
 0x11b   :  { %v218_v1 = vadd.f32 %v217_v63, %v216_v60  ;;  %v230_v7 = vrot.slane %v229_v0, 4 }
 0x11d   :  { %v219_v3 = vrot.slane %v218_v1, 2  ;;  %v231_v8 = vadd.f32 %v230_v7, %v229_v0 }
 0x11f   :  { %v220_v4 = vadd.f32 %v219_v3, %v218_v1  ;;  %v232_v9 = vrot.slane %v231_v8, 2 }
 0x121   :  { %v221_v5 = vrot.slane %v220_v4, 1 }
 0x123   :  { %v222_v6 = vadd.f32 %v221_v5, %v220_v4 }
 0x125   :  { %673 = vmatmul.mubr.f32.vlgmr.msra.gmra.mrb[0].mxu1 %v222_v6 }
 0x126   :  { %746 = vmatpush3.bf16.msra.mxu1 %v859_v10  ;;  %707 = vmatprep.mubr.msk.f32.mxu1 %vm796_vm2, %v797_v45  ;;  %v233_v10 = vadd.f32 %v232_v9, %v231_v8 }
 0x127   :  { %747 = vmatprep.subr.bf16.mxu1 %v795_v2 }
 0x128   :  { %v234_v11 = vrot.slane %v233_v10, 1 }
 0x12a   :  { %749 = vmatpush3.bf16.msra.mxu1 %v871_v14  ;;  %v235_v12 = vadd.f32 %v234_v11, %v233_v10 }
 0x12b   :  { %750 = vmatprep.subr.bf16.mxu1 %v795_v2 }
 0x12e   :  { %752 = vmatpush3.bf16.msra.mxu1 %v727_v29  ;;  %v552_v29 = vlaneseq }
 0x12f   :  { %753 = vmatprep.subr.bf16.mxu1 %v795_v2 }
 0x130   :  { %v553_v30 = vshrl.u32 %v552_v29, 7 }
 0x132   :  { %755 = vmatpush3.bf16.msra.mxu1 %v730_v32  ;;  %v554_v31 = vsub.s32 0, %v553_v30 }
 0x133   :  { %756 = vmatprep.subr.bf16.mxu1 %v795_v2 }
 0x136   :  { %758 = vmatpush3.bf16.msra.mxu1 %v733_v35 }
 0x137   :  { %759 = vmatprep.subr.bf16.mxu1 %v795_v2 }
 0x13a   :  { %761 = vmatpush3.bf16.msra.mxu1 %v736_v38 }
 0x13b   :  { %762 = vmatprep.subr.bf16.mxu1 %v795_v2 }
 0x13e   :  { %764 = vmatpush3.bf16.msra.mxu1 %v739_v41 }
 0x13f   :  { %765 = vmatprep.subr.bf16.mxu1 %v795_v2 }
 0x142   :  { %767 = vmatpush3.bf16.msra.mxu1 %v742_v44 }
 0x143   :  { %710 = vmatprep.subr.mxu1 %v797_v45 }
 0x145   :  { %708 = vmatmul.mubr.f32.vlgmr.msra.gmra.mrb[2].mxu1 %v235_v12 }
 0x146   :  { %712 = vmatprep.mubr.msk.f32.mxu1 %vm796_vm2, %v797_v45  ;;  %711 = vmatpush3.msra.mxu1 %v404_v13 }
 0x1f8   :  { %v318_v14 = vpop.f32.mrb[0].mxu1 }
 0x1f9   :  { %v674_v15 = vpop.f32.mrb[1].mxu1  ;;  %v322_v16 = vmul.f32 0.001953125, %v318_v14 }
 0x1fb   :  { %v394_v18 = vmul.f32 %v322_v16, %v322_v16 }
 0x218   :  { %v389_v17 = vpop.f32.mrb[2].mxu1 }
 0x219   :  { %v393_v19 = vmul.f32 0.001953125, %v389_v17  ;;  %v709_v2 = vpop.f32.mrb[3].mxu1 }
 0x21b   :  { %v395_v20 = vsub.f32 %v393_v19, %v394_v18 }
 0x21d   :  { %v396_v21 = vmax.f32 %v395_v20, 0.0 }
 0x21f   :  { %v398_v22 = vadd.f32 1e-05, %v396_v21 }
 0x221   :  { %792 = vrsqrt.f32 %v398_v22 }
 0x22b   :  { %v793_v24 = vpop.eup %792 }
 0x22c   :  { %v400_v25 = vmul.f32 %v793_v24, %v397_v23 }
 0x22e   :  { %v402_v27 = vmul.f32 %v400_v25, %v322_v16  ;;  %713 = vmatmul.mubr.msk.f32.vlgmr.msra.gmra.mrb[4].mxu1 %vm405_vm3, %v400_v25 }
 0x230   :  { %v403_v28 = vsub.f32 %v401_v26, %v402_v27 }
 0x232   :  { %718 = vmatmul.mubr.msk.f32.vlgmr.msra.gmra.mrb[8].mxu0 %vm405_vm3, %v403_v28 }
 0x301   :  { %v475_v32 = vpop.f32.mrb[4].mxu1 }
 0x302   :  { %v555_v33 = vrot.slane %v475_v32, %v554_v31  ;;  %v714_v34 = vpop.f32.mrb[5].mxu1 }
 0x304   :  { %v556_v35 = vmul.f32 %v555_v33, %v954_v46  ;;  %v557_v36 = vmul.f32 %v555_v33, %v956_v48  ;;  %v558_v37 = vmul.f32 %v555_v33, %v964_v54  ;;  %v559_v38 = vmul.f32 %v555_v33, %v969_v58 }
 0x305   :  { %v548_v39 = vpop.f32.mrb[8].mxu0 }
 0x306   :  { %v563_v40 = vrot.slane %v548_v39, %v554_v31  ;;  %v719_v41 = vpop.f32.mrb[9].mxu0 }
 0x308   :  { %v564_v42 = vadd.f32 %v563_v40, %v556_v35  ;;  %v565_v43 = vadd.f32 %v563_v40, %v557_v36  ;;  %v566_v44 = vadd.f32 %v563_v40, %v558_v37  ;;  %v567_v45 = vadd.f32 %v563_v40, %v559_v38 }
 0x30a   :  { %v568_v47 = vmax.f32 %v564_v42, 0.0  ;;  %v569_v49 = vmax.f32 %v565_v43, 0.0  ;;  %v570_v50 = vmax.f32 %v566_v44, 0.0  ;;  %v571_v51 = vmax.f32 %v567_v45, 0.0 }
 0x30c   :  { %572 = vst [vmem:[%s1016_s6] sm:$0xff] %v568_v47  ;;  %573 = vst [vmem:[%s1016_s6 + $0x8] sm:$0xff] %v569_v49 }
 0x30d   :  { %574 = vst [vmem:[%s1016_s6 + $0x10] sm:$0xff] %v570_v50  ;;  %575 = vst [vmem:[%s1016_s6 + $0x18] sm:$0xff] %v571_v51 }

</bundles_post_ra>
